<compile_context>
chip_gen: v5e
topology: v5e:2x2
jax: 0.10.0
libtpu: 0.0.40
codegen_flags: <defaults>
</compile_context>

<pallas_src>
import functools

import jax
import jax.numpy as jnp
from jax.experimental import pallas as pl
from jax.experimental.pallas import tpu as pltpu


_MIN_LANES = 128                      # below this, plain XLA beats Pallas
_VMEM_LIMIT = 32 * 1024 * 1024        # safe on v5e/v6e/v7x


def _round_down(v, m):
    return (v // m) * m


def _pad8(v):
    return -(-v // 8) * 8


def _pad128(v):
    return -(-v // 128) * 128


# ----------------------------- init kernel --------------------------------- #

def _init_kernel(x_ref, sum_ref, sq_ref, *, hb, total_h, lane_partials):
    # x_ref block: (1, C, hb) slab of the native (B, C, H) input.
    # sum_ref/sq_ref: (1, C, L) per-batch partial accumulators (output blocks,
    # resident across the "arbitrary" k axis; B axis is "parallel").
    k = pl.program_id(1)

    @pl.when(k == 0)
    def _():
        sum_ref[...] = jnp.zeros_like(sum_ref)
        sq_ref[...] = jnp.zeros_like(sq_ref)

    x = x_ref[0].astype(jnp.float32)                       # (C, hb)

    if total_h % hb != 0:                                  # static: ragged H tiles
        lane = jax.lax.broadcasted_iota(jnp.int32, (1, hb), 1)
        x = jnp.where(k * hb + lane < total_h, x, 0.0)

    if lane_partials:
        # hb % 128 == 0: accumulate per-lane partials on the VALU only; the
        # single cross-lane reduce happens in the wrapper.
        ngroups = hb // 128
        s = x[:, :128]
        q = s * s
        for g in range(1, ngroups):
            xi = x[:, g * 128:(g + 1) * 128]
            s = s + xi
            q = q + xi * xi
        sum_ref[0] = sum_ref[0] + s                        # (C, 128)
        sq_ref[0] = sq_ref[0] + q
    else:
        # hb not a multiple of 128 (full-extent H): one cross-lane reduce/tile.
        sum_ref[0] = sum_ref[0] + jnp.sum(x, axis=1, keepdims=True)   # (C, 1)
        sq_ref[0] = sq_ref[0] + jnp.sum(x * x, axis=1, keepdims=True)


def _pick_init_hb(C, H, itemsize, target=4 << 20):
    """Lane tile for the (C, hb) init slab: ~target bytes, capped at 8192 lanes."""
    pad_c = _pad8(C)
    max_h = max(128, _round_down(target // (pad_c * itemsize), 128))
    max_h = min(max_h, 8192)
    return H if H <= max_h else max_h


def _finalize_stats(s, q, n, C):
    # NOTE: one-pass var = E[x^2] - mean^2 can cancel badly for huge n or
    # |mean| >> std; partials are combined pairwise by XLA here which helps.
    n = jnp.float32(n)
    mean = s / n
    # torch.std default is unbiased (ddof=1); n==1 gives inf/nan just like torch.
    var = jnp.maximum((q - n * mean * mean) / (n - 1.0), 0.0)
    std = jnp.sqrt(var)
    loc = (-mean).reshape(1, C, 1)
    scale = (1.0 / (std + 1e-6)).reshape(1, C, 1)
    return loc, scale


def actnorm_init(x):
    """Data-dependent init on native (B, C, H): returns (loc, scale), each (1, C, 1)."""
    B, C, H = x.shape

    if H < _MIN_LANES:
        # Lane-sparse / tiny: plain XLA (per review).
        flat = jnp.swapaxes(x, 0, 1).reshape(C, -1).astype(jnp.float32)
        return _finalize_stats(jnp.sum(flat, axis=1), jnp.sum(flat * flat, axis=1),
                               B * H, C)

    hb = _pick_init_hb(C, H, x.dtype.itemsize)
    n_h = pl.cdiv(H, hb)
    lane_partials = (hb % 128 == 0)
    L = 128 if lane_partials else 1

    kernel = functools.partial(_init_kernel, hb=hb, total_h=H,
                               lane_partials=lane_partials)
    sum_part, sq_part = pl.pallas_call(
        kernel,
        out_shape=(jax.ShapeDtypeStruct((B, C, L), jnp.float32),
                   jax.ShapeDtypeStruct((B, C, L), jnp.float32)),
        grid=(B, n_h),
        in_specs=[pl.BlockSpec((1, C, hb), lambda b, k: (b, 0, k))],
        out_specs=(pl.BlockSpec((1, C, L), lambda b, k: (b, 0, 0)),
                   pl.BlockSpec((1, C, L), lambda b, k: (b, 0, 0))),
        compiler_params=pltpu.CompilerParams(
            dimension_semantics=("parallel", "arbitrary"),
            vmem_limit_bytes=_VMEM_LIMIT),
    )(x)

    # Tiny (B, C, L) partials -> per-channel stats in wrapper JAX.
    s = jnp.sum(sum_part, axis=(0, 2))
    q = jnp.sum(sq_part, axis=(0, 2))
    return _finalize_stats(s, q, B * H, C)


# ---------------------------- forward kernel -------------------------------- #

def _fwd_kernel(x_ref, loc_ref, scale_ref, y_ref):
    # x_ref/y_ref: (1, cb, hb) tile of the native (B, C, H) array.
    # loc_ref/scale_ref: (1, cb, 1) per-channel params, broadcast over lanes.
    x = x_ref[...].astype(jnp.float32)
    y = scale_ref[...] * (x + loc_ref[...])
    y_ref[...] = y.astype(y_ref.dtype)


def _pick_fwd_tiles(C, H, itemsize, target=3 << 20):
    """(cb, hb) for (1, cb, hb) x/y tiles, aiming at ~target VMEM bytes per tile."""
    cb, hb = C, H
    if _pad8(cb) * _pad128(hb) * itemsize > target:
        max_h = max(128, _round_down(target // (_pad8(cb) * itemsize), 128))
        if hb > max_h:
            hb = max_h                                  # multiple of 128
    if _pad8(cb) * _pad128(hb) * itemsize > target:
        max_c = max(8, _round_down(target // (_pad128(hb) * itemsize), 8))
        if cb > max_c:
            cb = max_c                                  # multiple of 8
    return cb, hb


def actnorm_forward(x, loc, scale):
    """y = scale * (x + loc) (Pallas, tiled); logdet = H * sum(log|scale|) (plain JAX)."""
    B, C, H = x.shape
    loc_f = loc.reshape(1, C, 1).astype(jnp.float32)
    scale_f = scale.reshape(1, C, 1).astype(jnp.float32)

    # logdet depends only on the C scalars -> wrapper-side JAX.
    logdet = jnp.float32(H) * jnp.sum(jnp.log(jnp.abs(scale_f)))

    if H < _MIN_LANES:
        # Lane-sparse: plain XLA is already optimal (per review).
        y = (scale_f * (x.astype(jnp.float32) + loc_f)).astype(x.dtype)
        return y, logdet

    cb, hb = _pick_fwd_tiles(C, H, x.dtype.itemsize)
    if B * pl.cdiv(C, cb) * pl.cdiv(H, hb) == 1 and H >= 2 * _MIN_LANES:
        # Guarantee >=2 blocks so v7x's second TensorCore gets work.
        hb = _round_down(pl.cdiv(H, 2), 128)

    grid = (B, pl.cdiv(C, cb), pl.cdiv(H, hb))
    y = pl.pallas_call(
        _fwd_kernel,
        out_shape=jax.ShapeDtypeStruct((B, C, H), x.dtype),
        grid=grid,
        in_specs=[pl.BlockSpec((1, cb, hb), lambda b, ci, hi: (b, ci, hi)),
                  pl.BlockSpec((1, cb, 1), lambda b, ci, hi: (0, ci, 0)),
                  pl.BlockSpec((1, cb, 1), lambda b, ci, hi: (0, ci, 0))],
        out_specs=pl.BlockSpec((1, cb, hb), lambda b, ci, hi: (b, ci, hi)),
        compiler_params=pltpu.CompilerParams(
            dimension_semantics=("parallel", "parallel", "parallel"),
            vmem_limit_bytes=_VMEM_LIMIT),
    )(x, loc_f, scale_f)
    return y, logdet


# ------------------------------- module ------------------------------------- #

class ActNorm2D:
    """Functional JAX/Pallas port of the PyTorch ActNorm2D module."""

    def __init__(self, in_dim, logdet=True):
        self.loc = jnp.zeros((1, in_dim, 1), jnp.float32)
        self.scale = jnp.ones((1, in_dim, 1), jnp.float32)
        self.initialized = False     # mirrors the uint8 'initialized' buffer
        self.logdet = logdet

    def __call__(self, x):
        # NOTE: host-side state mutation; not intended to run under jax.jit.
        if not self.initialized:
            self.loc, self.scale = actnorm_init(x)
            self.initialized = True
        y, logdet = actnorm_forward(x, self.loc, self.scale)
        if self.logdet:
            return y, logdet
        return y

    def reverse(self, output):
        # TODO(synk): reverse path kept in plain JAX (trivial elementwise glue)
        return output / self.scale - self.loc


# ------------------------------- reference ---------------------------------- #

def _ref_actnorm(x):
    B, C, H = x.shape
    flat = jnp.transpose(x, (1, 0, 2)).reshape(C, -1)
    mean = flat.mean(axis=1)
    std = jnp.std(flat, axis=1, ddof=1)
    loc = (-mean).reshape(1, C, 1)
    scale = (1.0 / (std + 1e-6)).reshape(1, C, 1)
    y = scale * (x + loc)
    logdet = H * jnp.sum(jnp.log(jnp.abs(scale)))
    return y, logdet


# --------------------------------- main -------------------------------------- #

if __name__ == "__main__":
    key = jax.random.PRNGKey(0)
    # Shapes exercise: lane-partial init (256), odd full-extent H (1300),
    # ragged tiled init + tiled forward (640x2048), and the small-H XLA path (16).
    shapes = [(2, 4, 256), (3, 8, 1300), (2, 640, 2048), (2, 4, 16)]
    for (B, C, H) in shapes:
        key, sub = jax.random.split(key)
        x = jax.random.normal(sub, (B, C, H), dtype=jnp.float32) * 1.7 + 0.3

        model = ActNorm2D(C, logdet=True)
        y, logdet = model(x)
        y = jax.block_until_ready(y)
        logdet = jax.block_until_ready(logdet)

        y_ref, logdet_ref = _ref_actnorm(x)
        assert jnp.allclose(y, y_ref, atol=1e-4, rtol=1e-4), \
            f"output mismatch at shape {(B, C, H)}"
        assert jnp.allclose(logdet, logdet_ref, atol=1e-4, rtol=1e-4), \
            f"logdet mismatch at shape {(B, C, H)}"

    print("KERNEL_OK")
</pallas_src>

<mosaic_0001>
module attributes {stable_mosaic.version = 11 : i64} {
  func.func @_init_kernel(%arg0: i32, %arg1: i32, %arg2: memref<1x4x256xf32, #tpu.memory_space<vmem>>, %arg3: memref<1x4x128xf32, #tpu.memory_space<vmem>>, %arg4: memref<1x4x128xf32, #tpu.memory_space<vmem>>) attributes {dimension_semantics = [#tpu.dimension_semantics<parallel>, #tpu.dimension_semantics<arbitrary>], iteration_bounds = array<i64: 2, 1>, scalar_prefetch = 0 : i64, scratch_operands = 0 : i64, tpu.core_type = #tpu.core_type<tc>, window_params = [{transform_indices = @transform_0, window_bounds = array<i64: 1, 4, 256>}, {transform_indices = @transform_1, window_bounds = array<i64: 1, 4, 128>}, {transform_indices = @transform_2, window_bounds = array<i64: 1, 4, 128>}]} {
    %c0_i32 = arith.constant 0 : i32
    %0 = arith.cmpi eq, %arg1, %c0_i32 : i32
    %1 = arith.extui %0 : i1 to i32
    %c0_i32_0 = arith.constant 0 : i32
    %2 = arith.cmpi ne, %1, %c0_i32_0 : i32
    scf.if %2 {
      %cst = arith.constant 0.000000e+00 : f32
      %23 = vector.broadcast %cst : f32 to vector<1x4x128xf32>
      %c0_15 = arith.constant 0 : index
      %c0_16 = arith.constant 0 : index
      %c0_17 = arith.constant 0 : index
      %24 = vector.load %arg3[%c0_15, %c0_16, %c0_17] : memref<1x4x128xf32, #tpu.memory_space<vmem>>, vector<1x4x128xf32>
      tpu.vector_store %arg3[%c0_15, %c0_16, %c0_17], %23 {strides = array<i32>} : memref<1x4x128xf32, #tpu.memory_space<vmem>>, vector<1x4x128xf32>,
      %cst_18 = arith.constant 0.000000e+00 : f32
      %25 = vector.broadcast %cst_18 : f32 to vector<1x4x128xf32>
      %c0_19 = arith.constant 0 : index
      %c0_20 = arith.constant 0 : index
      %c0_21 = arith.constant 0 : index
      %26 = vector.load %arg4[%c0_19, %c0_20, %c0_21] : memref<1x4x128xf32, #tpu.memory_space<vmem>>, vector<1x4x128xf32>
      tpu.vector_store %arg4[%c0_19, %c0_20, %c0_21], %25 {strides = array<i32>} : memref<1x4x128xf32, #tpu.memory_space<vmem>>, vector<1x4x128xf32>,
    } else {
    }
    %c0 = arith.constant 0 : index
    %c0_1 = arith.constant 0 : index
    %c0_2 = arith.constant 0 : index
    %3 = vector.load %arg2[%c0, %c0_1, %c0_2] : memref<1x4x256xf32, #tpu.memory_space<vmem>>, vector<1x4x256xf32>
    %4 = vector.shape_cast %3 : vector<1x4x256xf32> to vector<4x256xf32>
    %5 = vector.extract_strided_slice %4 {offsets = [0, 0], sizes = [4, 128], strides = [1, 1]} : vector<4x256xf32> to vector<4x128xf32>
    %6 = arith.mulf %5, %5 : vector<4x128xf32>
    %7 = vector.extract_strided_slice %4 {offsets = [0, 128], sizes = [4, 128], strides = [1, 1]} : vector<4x256xf32> to vector<4x128xf32>
    %8 = arith.addf %5, %7 : vector<4x128xf32>
    %9 = arith.mulf %7, %7 : vector<4x128xf32>
    %10 = arith.addf %6, %9 : vector<4x128xf32>
    %c0_3 = arith.constant 0 : index
    %c0_4 = arith.constant 0 : index
    %c0_5 = arith.constant 0 : index
    %11 = vector.load %arg3[%c0_3, %c0_4, %c0_5] : memref<1x4x128xf32, #tpu.memory_space<vmem>>, vector<1x4x128xf32>
    %12 = vector.shape_cast %11 : vector<1x4x128xf32> to vector<4x128xf32>
    %13 = arith.addf %12, %8 : vector<4x128xf32>
    %c0_6 = arith.constant 0 : index
    %c0_7 = arith.constant 0 : index
    %c0_8 = arith.constant 0 : index
    %14 = vector.load %arg3[%c0_6, %c0_7, %c0_8] : memref<1x4x128xf32, #tpu.memory_space<vmem>>, vector<1x4x128xf32>
    %15 = vector.shape_cast %14 : vector<1x4x128xf32> to vector<4x128xf32>
    %16 = vector.shape_cast %13 : vector<4x128xf32> to vector<1x4x128xf32>
    tpu.vector_store %arg3[%c0_6, %c0_7, %c0_8], %16 {strides = array<i32>} : memref<1x4x128xf32, #tpu.memory_space<vmem>>, vector<1x4x128xf32>,
    %c0_9 = arith.constant 0 : index
    %c0_10 = arith.constant 0 : index
    %c0_11 = arith.constant 0 : index
    %17 = vector.load %arg4[%c0_9, %c0_10, %c0_11] : memref<1x4x128xf32, #tpu.memory_space<vmem>>, vector<1x4x128xf32>
    %18 = vector.shape_cast %17 : vector<1x4x128xf32> to vector<4x128xf32>
    %19 = arith.addf %18, %10 : vector<4x128xf32>
    %c0_12 = arith.constant 0 : index
    %c0_13 = arith.constant 0 : index
    %c0_14 = arith.constant 0 : index
    %20 = vector.load %arg4[%c0_12, %c0_13, %c0_14] : memref<1x4x128xf32, #tpu.memory_space<vmem>>, vector<1x4x128xf32>
    %21 = vector.shape_cast %20 : vector<1x4x128xf32> to vector<4x128xf32>
    %22 = vector.shape_cast %19 : vector<4x128xf32> to vector<1x4x128xf32>
    tpu.vector_store %arg4[%c0_12, %c0_13, %c0_14], %22 {strides = array<i32>} : memref<1x4x128xf32, #tpu.memory_space<vmem>>, vector<1x4x128xf32>,
    return
  }
  func.func @transform_0(%arg0: i32, %arg1: i32) -> (i32, i32, i32) {
    %c0_i32 = arith.constant 0 : i32
    %c0_i32_0 = arith.constant 0 : i32
    return %arg0, %c0_i32, %arg1 : i32, i32, i32
  }
  func.func @transform_1(%arg0: i32, %arg1: i32) -> (i32, i32, i32) {
    %c0_i32 = arith.constant 0 : i32
    %c0_i32_0 = arith.constant 0 : i32
    %c0_i32_1 = arith.constant 0 : i32
    return %arg0, %c0_i32, %c0_i32_0 : i32, i32, i32
  }
  func.func @transform_2(%arg0: i32, %arg1: i32) -> (i32, i32, i32) {
    %c0_i32 = arith.constant 0 : i32
    %c0_i32_0 = arith.constant 0 : i32
    %c0_i32_1 = arith.constant 0 : i32
    return %arg0, %c0_i32, %c0_i32_0 : i32, i32, i32
  }
}

</mosaic_0001>

<bundles_post_ra>
// kernel: tpu_custom_call.1
= control target key start
LH: loop header
LB: loop body
LE: loop exit
PB: predicated region body
PF: predicated region fallthrough
CT: control target
= control target key end

     0   :  { %8 = vsyncpa [#allocation3], 0  ;;  %s755_s0 = inlined_call_operand.hbm [shape: f32[2,4,256], index: 0, kind: input, shape index: {}]   ;;  %s756_s1 = inlined_call_operand.hbm [shape: f32[2,4,128], index: 1, kind: output, shape index: {0}]   ;;  %s757_s2 = inlined_call_operand.hbm [shape: f32[2,4,128], index: 2, kind: output, shape index: {1}]  }
   0x1   :  { %10 = vsyncpa [#allocation3 + $0x1], 0 }
   0x2   :  { %11 = vsyncpa [#allocation4], 0 }
   0x3   :  { %13 = vsyncpa [#allocation4 + $0x1], 0 }
   0x4   :  { %14 = vsyncpa [#allocation7], 0 }
   0x5   :  { %16 = vsyncpa [#allocation7 + $0x1], 0  ;;  %s607_s9 = smov 0   ;;  %s609_s10 = smov 0  }
   0x6   :  { %s611_s11 = smov 0   ;;  %s613_s12 = smov 0  }
   0x7   :  { %s615_s13 = smov 0   ;;  %s617_s14 = smov 0  }
   0x8 LB: > { %s359_s15 = sadd.s32 4294967295, %s589_s14   ;;  %s360_s16 = sadd.s32 4294967294, %s589_s14   ;;  %s589_s14 = sphi %s617_s14, %s22_s14   ;;  %s585_s13 = sphi %s615_s13, %s766_s13   ;;  %s581_s12 = sphi %s613_s12, %s765_s12   ;;  %s577_s11 = sphi %s611_s11, %s764_s11   ;;  %s573_s10 = sphi %s609_s10, %s763_s10   ;;  %s569_s9 = sphi %s607_s9, %s762_s9  }
   0x9   : > { %s34_s17 = sadd.s32 1, %s585_s13  ;;  %s43_s18 = sadd.s32 1, %s577_s11 }
   0xa   : > { %p36_p0 = scmp.ge.s32.totalorder %s34_s17, 2  ;;  %p50_p1 = scmp.ne.s32.totalorder %s577_s11, %s573_s10 }
   0xb   : > { %p51_p2 = scmp.eq.s32.totalorder %s589_s14, 0  ;;  %p56_p3 = scmp.ne.s32.totalorder %s573_s10, %s569_s9 }
   0xc   : > { %s768_s17 = smov (%p36_p0, %s34_s17), 0  ;;  %p57_p5 = scmp.eq.s32.totalorder %s359_s15, 0 }
   0xd   : > { %p648_p4 = por %p51_p2, %p50_p1  ;;  %s38_s20 = ssub.s32 %s585_s13, %s768_s17 }
   0xe   : > { %p80_p6 = scmp.eq.s32.totalorder %s359_s15, 1  ;;  %p41_p7 = scmp.eq.s32.totalorder %s38_s20, 0 }
   0xf   : > { %p654_p8 = por %p57_p5, %p56_p3  ;;  %p86_p10 = scmp.eq.s32.totalorder %s360_s16, 1 }
  0x10   : > { %p658_p9 = por %p80_p6, %p50_p1  ;;  %p362_p12 = scmp.ge.s32.totalorder %s589_s14, 2 }
  0x11   : > { %s663_s23 = scalar_select %p41_p7, %s577_s11, %s43_s18  }
  0x12   : > { %p665_p11 = por %p86_p10, %p56_p3  ;;  %p394_p13 = scmp.lt.s32.totalorder %s589_s14, 2 }
  0x13   : > { %s132_s25 = sand.u32 1, %s577_s11   ;;  %s376_s27 = sshll.u32 %s585_s13, 3 }
  0x14   : > { %s363_s26 = sshll.u32 %s132_s25, 3  ;;  %s143_s30 = scalar_lea.hbm %s755_s0, %s376_s27 }
  0x15   : > { %s136_s3 = scalar_lea.vmem [#allocation2], %s363_s26  ;;  %s145_s5 = sshll.u32 %s143_s30, 4  ;;  %s146_s5 = int_to_ptr.hbm [resolvable:$true] %s145_s5 }
  0x16   : > { %s147_s4 = sshll.u32 %s136_s3, 4  ;;  %p384_p0 = pnand %p394_p13, %p648_p4  ;;  %s148_s4 = int_to_ptr.vmem [resolvable:$true] %s147_s4 }
  0x17   : > { %p366_p1 = scmp.ge.s32.totalorder %s589_s14, 1  ;;  %p152_p2 = scmp.lt.s32.totalorder %s589_s14, 3 }
  0x18   : > { %s133_s6 = scalar_lea.sflag [#allocation3], %s132_s25 }
  0x19   : > { %386 = dma.hbm_to_vmem [thread:$0]  (!%p384_p0), %s146_s5, 128, %s148_s4, %s133_s6  }
  0x1a   : > { %p153_p3 = pnand %p366_p1, %p152_p2 }
  0x1b   : > { %s681_s7 = sand.u32 (!%p153_p3), 1, %s573_s10  }
  0x1c   : > { %156 = sbr.rel (%p153_p3) target bundleno = 63 (0x3f), region = 24  ;;  %s367_s8 = sshll.u32 (!%p153_p3), %s681_s7, 3 }
  0x1d   : > { %s159_s15 = scalar_lea.sflag (!%p153_p3), [#allocation3], %s681_s7  ;;  %s162_s16 = scalar_lea.vmem (!%p153_p3), [#allocation2], %s367_s8 }
  0x21   : > { %556 = dma.done.wait (%p654_p8), %s159_s15, 128  }
  0x22   : > { %558 = vsyncadd (%p654_p8), %s159_s15, 4294967168  ;;  %s368_s18 = sshll.u32 %s681_s7, 2  ;;  %v591_v0 = vmov 0.0   ;;  %s372_s25 = sshll.u32 %s581_s12, 2  ;;  %v196_v1 = vld [vmem:[%s162_s16] sm:$0xff] }
  0x23   : > { %s181_s19 = scalar_lea.vmem [#allocation5], %s368_s18  ;;  %s690_s20 = scalar_lea.vmem [#allocation6], %s368_s18  ;;  %v199_v2 = vrot.slane %v196_v1, 4  ;;  %v197_v3 = vmul.f32 %v196_v1, %v196_v1 }
  0x24   : > { %194 = vst [vmem:[%s181_s19] sm:$0xf] %v591_v0  ;;  %s226_s28 = scalar_lea.hbm %s756_s1, %s372_s25  ;;  %s240_s30 = scalar_lea.hbm %s757_s2, %s372_s25 }
  0x25   : > { %195 = vst [vmem:[%s690_s20] sm:$0xf] %v591_v0  ;;  %s228_s3 = sshll.u32 %s181_s19, 4  ;;  %s230_s4 = sshll.u32 %s226_s28, 4  ;;  %v201_v5 = vadd.f32 %v199_v2, %v196_v1  ;;  %v202_v6 = vmul.f32 %v199_v2, %v199_v2  ;;  %s229_s3 = int_to_ptr.vmem [resolvable:$true] %s228_s3  ;;  %s231_s4 = int_to_ptr.hbm [resolvable:$true] %s230_s4 }
  0x26   : > { %s242_s12 = sshll.u32 %s690_s20, 4  ;;  %s244_s5 = sshll.u32 %s240_s30, 4  ;;  %s702_s12 = int_to_ptr.vmem [resolvable:$true] %s242_s12  ;;  %s704_s5 = int_to_ptr.hbm [resolvable:$true] %s244_s5 }
  0x27   : > { %v203_v9 = vadd.f32 %v202_v6, %v197_v3  ;;  %s211_s6 = scalar_lea.sflag [#allocation4], %s681_s7  ;;  %s489_s8 = sshra.s32 %s231_s4, 4  ;;  %s490_s8 = int_to_ptr.hbm [resolvable:$true] %s489_s8 }
  0x28   : > { %s491_s15 = scalar_lea.hbm %s490_s8, 4  ;;  %s495_s25 = scalar_lea.hbm %s756_s1, 8 }
  0x29   : > { %p492_p4 = scmp.ne.s32.totalorder %s490_s8, %s491_s15  ;;  %p496_p7 = scmp.lt.s32.totalorder %s490_s8, %s756_s1 }
  0x2a   : > { %p497_p8 = scmp.lt.s32.totalorder %s495_s25, %s491_s15 }
  0x2b   : > { %v204_v4 = vld [vmem:[%s181_s19] sm:$0xf]  ;;  %p493_p5 = pnand %p492_p4, %p658_p9 }
  0x2c   : > { %v207_v7 = vld [vmem:[%s690_s20] sm:$0xf]  ;;  %v205_v8 = vadd.f32 %v204_v4, %v201_v5  ;;  %p498_p10 = por %p497_p8, %p496_p7 }
  0x2d   : > { %v208_v10 = vadd.f32 %v207_v7, %v203_v9  ;;  %p494_p6 = pneg %p493_p5 }
  0x2e   : > { %206 = vst [vmem:[%s181_s19] sm:$0xf] %v205_v8 }
  0x2f   : > { %p499_p13 = pnand %p498_p10, %p494_p6 }
  0x31   : > { %502 = shalt.err (!%p499_p13)
}
  0x32   : > { %379 = dma.vmem_to_hbm [thread:$0]  (%p658_p9), %s229_s3, 64, %s231_s4, %s211_s6   ;;  %209 = vst [vmem:[%s690_s20] sm:$0xf] %v208_v10 }
  0x33   : > { %s216_s19 = scalar_lea.sflag [#allocation7], %s681_s7  ;;  %s517_s28 = sshra.s32 %s704_s5, 4  ;;  %s518_s28 = int_to_ptr.hbm [resolvable:$true] %s517_s28 }
  0x34   : > { %s519_s21 = scalar_lea.hbm %s518_s28, 4  ;;  %s523_s8 = scalar_lea.hbm %s757_s2, 8 }
  0x35   : > { %p520_p0 = scmp.ne.s32.totalorder %s518_s28, %s519_s21  ;;  %p524_p3 = scmp.lt.s32.totalorder %s518_s28, %s757_s2 }
  0x36   : > { %p525_p4 = scmp.lt.s32.totalorder %s523_s8, %s519_s21 }
  0x37   : > { %p521_p1 = pnand %p520_p0, %p658_p9 }
  0x38   : > { %p526_p5 = por %p525_p4, %p524_p3 }
  0x39   : > { %p522_p2 = pneg %p521_p1 }
  0x3b   : > { %p527_p6 = pnand %p526_p5, %p522_p2 }
  0x3d   : > { %530 = shalt.err (!%p527_p6)
}
  0x3e   : > { %380 = dma.vmem_to_hbm [thread:$0]  (%p658_p9), %s702_s12, 64, %s704_s5, %s216_s19  }
  0x3f PF: > { %s256_s7 = sand.u32 1, %s569_s9   ;;  %p388_p7 = pnand %p362_p12, %p665_p11 }
  0x40   : > { %s257_s20 = scalar_lea.sflag [#allocation4], %s256_s7 }
  0x41   : > { %p389_p8 = pneg %p388_p7 }
  0x43   : > { %560 = dma.done.wait (%p389_p8), %s257_s20, 64  }
  0x44   : > { %562 = vsyncadd (%p389_p8), %s257_s20, 4294967232  ;;  %s267_s3 = scalar_lea.sflag [#allocation7], %s256_s7 }
  0x45   : > { %564 = dma.done.wait (%p389_p8), %s267_s3, 64  }
  0x46   : > { %566 = vsyncadd (%p389_p8), %s267_s3, 4294967232  ;;  %s22_s14 = sadd.s32 1, %s589_s14   ;;  %s762_s9 = smov %s573_s10 }
  0x47   : > { %p19_p10 = scmp.ge.s32.totalorder %s22_s14, 4   ;;  %s763_s10 = smov %s577_s11 }
  0x48   : > { %s764_s11 = smov %s663_s23  ;;  %s765_s12 = smov %s585_s13 }
  0x49   : > { %s766_s13 = smov %s768_s17  ;;  %21 = sbr.rel (!%p19_p10) target bundleno = 8 (0x8), region = 90 }
  0x4e   :  { %273 = vsyncpa [#allocation3], 1 }
  0x4f   :  { %275 = vsyncpa [#allocation3 + $0x1], 1 }
  0x50   :  { %276 = vsyncpa [#allocation4], 1 }
  0x51   :  { %278 = vsyncpa [#allocation4 + $0x1], 1 }
  0x52   :  { %279 = vsyncpa [#allocation7], 1 }
  0x53   :  { %281 = vsyncpa [#allocation7 + $0x1], 1 }

</bundles_post_ra>
